<compile_context>
chip_gen: v7x
topology: tpu7x:2x2x1
jax: 0.10.0
libtpu: 0.0.40
codegen_flags: <defaults>
</compile_context>

<pallas_src>
import math
import functools

import jax
import jax.numpy as jnp
from jax.experimental import pallas as pl
from jax.experimental.pallas import tpu as pltpu


def _copy_kernel(x_ref, o_ref):
    # Identity copy of one lane/sublane-dense tile (the reshape "hot path").
    o_ref[...] = x_ref[...]


def _choose_layout(total, sublane):
    """Factor `total` elements into (rows, cols) with cols a multiple of 128.

    Pass 1 also requires rows to be a multiple of the dtype-aware sublane
    count so tiles are fully dense (unmasked vld/vst).  Pass 2 relaxes the
    row constraint (single full-extent row block).  Returns None if `total`
    is not a multiple of 128.
    """
    for c in (4096, 2048, 1024, 512, 256, 128):
        if total % c == 0 and (total // c) % sublane == 0:
            return total // c, c
    for c in (4096, 2048, 1024, 512, 256, 128):
        if total % c == 0:
            return total // c, c
    return None


def _choose_row_tile(rows, cols, itemsize, sublane, target_tile_bytes):
    """Rows per block: multiple of `sublane`, ~target_tile_bytes per tile,
    and an exact divisor of `rows` (no ragged / masked last block)."""
    if rows % sublane != 0:
        return rows  # must use full-extent rows (block dim == array dim)
    tr = (target_tile_bytes // (cols * itemsize)) // sublane * sublane
    tr = max(sublane, min(tr, rows))
    while tr > sublane and rows % tr != 0:
        tr -= sublane
    if rows % tr != 0:
        tr = rows
    return tr


@functools.partial(jax.jit, static_argnums=(1,))
def _pallas_reshape_impl(x, target_shape):
    batch = x.shape[0]
    flat = math.prod(x.shape[1:]) if x.ndim > 1 else 1
    tgt_flat = math.prod(target_shape) if len(target_shape) > 0 else 1
    assert tgt_flat == flat, "target shape must preserve element count per batch"

    total = batch * flat
    itemsize = jnp.dtype(x.dtype).itemsize
    # f32 -> 8, bf16 -> 16, int8/fp8 -> 32 sublanes per packed vreg row group.
    sublane = max(8, 32 // max(1, itemsize))

    layout = _choose_layout(total, sublane)

    if layout is None:
        # TODO(synk): element count not a multiple of 128 -- fall back to a
        # single full-array block copy (correct, but not tiled/optimized).
        x1d = x.reshape(1, total)
        out = pl.pallas_call(
            _copy_kernel,
            out_shape=jax.ShapeDtypeStruct((1, total), x.dtype),
            input_output_aliases={0: 0},
        )(x1d)
        return out.reshape((batch, *target_shape))

    rows, cols = layout
    tr = _choose_row_tile(rows, cols, itemsize, sublane,
                          target_tile_bytes=2 * 1024 * 1024)

    # Flatten the WHOLE tensor into a lane-dense 2-D view (metadata only for a
    # contiguous row-major array; row-major element order is preserved).
    x2d = x.reshape(rows, cols)

    out2d = pl.pallas_call(
        _copy_kernel,
        out_shape=jax.ShapeDtypeStruct((rows, cols), x.dtype),
        grid_spec=pltpu.PrefetchScalarGridSpec(
            num_scalar_prefetch=0,
            grid=(rows // tr,),
            in_specs=[pl.BlockSpec((tr, cols), lambda i: (i, 0))],
            out_specs=pl.BlockSpec((tr, cols), lambda i: (i, 0)),
        ),
        # Alias input buffer to output: XLA may elide the second HBM copy.
        input_output_aliases={0: 0},
        compiler_params=pltpu.CompilerParams(
            dimension_semantics=("parallel",),   # shard row tiles across TCs
            vmem_limit_bytes=32 * 1024 * 1024,   # 4 x ~2 MiB tiles << limit on all chips
        ),
    )(x2d)

    # Final target shape: pure metadata, no data movement.
    return out2d.reshape((batch, *target_shape))


def pallas_reshape(x, target_shape):
    """Reproduces Reshape(target_shape).forward(x): x.reshape(B, *target_shape)."""
    return _pallas_reshape_impl(x, tuple(int(d) for d in target_shape))


if __name__ == "__main__":
    key = jax.random.PRNGKey(0)
    # Input consistent with a conv feature map: NCHW = (2, 4, 16, 16)
    x = jax.random.normal(key, (2, 4, 16, 16), dtype=jnp.float32)

    # Module "parameter": the target view shape (deterministic, set in-script).
    target_shape = (16, 64)  # 4*16*16 == 16*64 == 1024 elements per batch

    out = pallas_reshape(x, target_shape)
    out = jax.block_until_ready(out)

    # Verify against the reference semantics (plain jnp reshape).
    ref = x.reshape((x.shape[0], *target_shape))
    assert out.shape == (2, 16, 64)
    assert out.dtype == x.dtype
    assert bool(jnp.array_equal(out, ref))

    print("KERNEL_OK")
</pallas_src>

<mosaic_0001>
module attributes {stable_mosaic.version = 11 : i64} {
  func.func @_copy_kernel(%arg0: i32, %arg1: memref<8x256xf32, #tpu.memory_space<vmem>>, %arg2: memref<8x256xf32, #tpu.memory_space<vmem>>) attributes {dimension_semantics = [#tpu.dimension_semantics<parallel>], iteration_bounds = array<i64: 1>, scalar_prefetch = 0 : i64, scratch_operands = 0 : i64, tpu.core_type = #tpu.core_type<tc>, window_params = [{transform_indices = @transform_0, window_bounds = array<i64: 8, 256>}, {transform_indices = @transform_1, window_bounds = array<i64: 8, 256>}]} {
    %c0 = arith.constant 0 : index
    %c0_0 = arith.constant 0 : index
    %0 = vector.load %arg1[%c0, %c0_0] : memref<8x256xf32, #tpu.memory_space<vmem>>, vector<8x256xf32>
    %c0_1 = arith.constant 0 : index
    %c0_2 = arith.constant 0 : index
    %1 = vector.load %arg2[%c0_1, %c0_2] : memref<8x256xf32, #tpu.memory_space<vmem>>, vector<8x256xf32>
    tpu.vector_store %arg2[%c0_1, %c0_2], %0 {strides = array<i32>} : memref<8x256xf32, #tpu.memory_space<vmem>>, vector<8x256xf32>,
    return
  }
  func.func @transform_0(%arg0: i32) -> (i32, i32) {
    %c0_i32 = arith.constant 0 : i32
    %c0_i32_0 = arith.constant 0 : i32
    return %arg0, %c0_i32 : i32, i32
  }
  func.func @transform_1(%arg0: i32) -> (i32, i32) {
    %c0_i32 = arith.constant 0 : i32
    %c0_i32_0 = arith.constant 0 : i32
    return %arg0, %c0_i32 : i32, i32
  }
}

</mosaic_0001>

<bundles_post_ra>
// kernel: _pallas_reshape_impl.1
= control target key start
LH: loop header
LB: loop body
LE: loop exit
PB: predicated region body
PF: predicated region fallthrough
CT: control target
= control target key end

     0   :  { %s38_s0 = inlined_call_operand.vmem [shape: f32[8,256], index: 0, kind: input, shape index: {}, may-alias: {0,1}]   ;;  %s39_s1 = inlined_call_operand.vmem [shape: f32[8,256], index: 1, kind: output, shape index: {}, may-alias: {0,1}]  }
   0x1   :  { %v8_v0 = vld [vmem:[%s38_s0] sm:$0xff]  ;;  %v9_v1 = vld [vmem:[%s38_s0 + $0x8] sm:$0xff] }
   0x2   :  { %10 = vst [vmem:[%s39_s1] sm:$0xff] %v8_v0  ;;  %11 = vst [vmem:[%s39_s1 + $0x8] sm:$0xff] %v9_v1 }

</bundles_post_ra>
